<compile_context>
chip_gen: v7x
topology: tpu7x:2x2x1
jax: 0.10.0
libtpu: 0.0.40
codegen_flags: <defaults>
</compile_context>

<pallas_src>
import functools
import math

import jax
import jax.numpy as jnp
from jax.experimental import pallas as pl
from jax.experimental.pallas import tpu as pltpu

_EPS = 1e-8        # torch.nn.CosineSimilarity default eps
_M_INIT = -1e30    # finite running-max init: avoids exp(-inf - (-inf)) = NaN


def _round_up(x, m):
    return ((x + m - 1) // m) * m


def _vmem_plan():
    """(scoped vmem_limit_bytes, per-call working-set budget), per chip.

    v7x has 64 MiB VMEM/TC -> limit 48 MiB; v5e/v6e have 128 MiB -> limit 96 MiB.
    """
    try:
        cap = int(pltpu.get_tpu_info().vmem_capacity_bytes)
    except Exception:
        cap = 64 * 1024 * 1024  # conservative default (v7x-sized)
    limit = min(cap * 3 // 4, 96 * 1024 * 1024)
    budget = int(limit * 0.7)
    return limit, budget


def _stage1_tile(b_pad, dim, phat_bytes, budget):
    """Largest batch tile that divides b_pad, is 16-aligned (bf16 sublane pack)
    or the full dim, and fits the double-buffered stage-1 working set."""
    per_row = dim * (2 * 2 * 4 + 2 * 2 * phat_bytes)  # zi+zj f32 in, (2,.,D) out, x2 bufs
    valid = [t for t in range(1, min(b_pad, 1024) + 1)
             if b_pad % t == 0 and (t % 16 == 0 or t == b_pad)]
    fitting = [t for t in valid if t * per_row <= budget]
    return max(fitting) if fitting else min(valid)


def _stage2_plan(n, dim, phat_bytes, budget, block_rows=None, block_cols=None):
    """Returns (n_pad, t_row, t_col) for the stage-2 grid."""

    def fits(tr, tc):
        blocks = 2 * (tr + tc) * dim * phat_bytes   # double-buffered p_hat blocks
        temps = 3 * tr * tc * 4                     # sim / exp f32 temporaries
        misc = 8 * tr * 4 + (1 << 20)               # lse/scratch + headroom
        return blocks + temps + misc <= budget

    if block_rows is not None or block_cols is not None:      # explicit override
        t_row = int(block_rows) if block_rows else 256
        t_col = int(block_cols) if block_cols else 256
        return _round_up(n, math.lcm(t_row, t_col)), t_row, t_col

    # Small problems: keep the whole p_hat resident as the column block (its
    # block index is constant, so it is fetched from HBM exactly once); grid
    # runs over row tiles only -> single HBM pass, no re-streaming.
    if n <= 1024:
        divs = [t for t in range(16, min(n, 256) + 1, 16) if n % t == 0]
        t_row = max(divs) if divs else n
        if fits(t_row, n):
            return n, t_row, n

    # Large problems: MXU-shaped 256-wide column tiles, row tiles as large as
    # VMEM allows (p_hat is re-read from HBM once per ROW tile, so bigger
    # t_row => proportionally fewer re-reads).
    n_pad = _round_up(n, 256)
    t_col = 256
    cands = [512, 256, 128, 64, 32, 16]
    if budget >= 60 * 1024 * 1024 and n_pad >= 4096:
        cands = [1024] + cands                      # 128-MiB-VMEM chips (v5e/v6e)
    for t_row in cands:
        if n_pad % t_row == 0 and fits(t_row, t_col):
            return n_pad, t_row, t_col
    return n_pad, 16, t_col


def _prep_kernel(zi_ref, zj_ref, phat_ref, pos_ref, *, scale):
    """Normalize rows (+ fold 1/sqrt(temperature)) and compute pair positives."""
    zi = zi_ref[...].astype(jnp.float32)                      # (TB, D)
    zj = zj_ref[...].astype(jnp.float32)                      # (TB, D)

    def _norm(x):
        sq = jnp.sum(x * x, axis=-1, keepdims=True)           # (TB, 1)
        # Clamp ||x||^2 at eps; identical to torch's max(||a||*||b||, eps)
        # clamp for any non-degenerate rows (zero-padded rows map to 0).
        inv = jax.lax.rsqrt(jnp.maximum(sq, _EPS))
        return x * (inv * scale)                               # scale = 1/sqrt(T)

    zi_h = _norm(zi)
    zj_h = _norm(zj)
    phat_ref[0] = zi_h.astype(phat_ref.dtype)                  # bf16 by default
    phat_ref[1] = zj_h.astype(phat_ref.dtype)
    # Positive similarity of pair i (already carries the 1/temperature factor),
    # computed from the f32 values (full precision regardless of p_hat dtype).
    pos_ref[...] = jnp.sum(zi_h * zj_h, axis=-1, keepdims=True)


def _lse_kernel(prow_ref, pcol_ref, lse_ref, m_sc, l_sc, *,
                t_row, t_col, batch, b_pad, padded):
    """Online (streaming) row-wise logsumexp over off-diagonal sim entries."""
    i = pl.program_id(0)   # row-tile index   ('parallel')
    j = pl.program_id(1)   # col-tile index   ('arbitrary', innermost)

    @pl.when(j == 0)
    def _():
        m_sc[...] = jnp.full_like(m_sc, _M_INIT)
        l_sc[...] = jnp.zeros_like(l_sc)

    # sim tile: contract last dims of both operands (A . B^T) -> MXU, f32 acc.
    # TODO(synk): verify with pl.lower_as_mlir on v5e that this lowers without a
    # per-step vxpose of the (t_col, D) tile; if it does, emit a transposed
    # (D, 2B) copy of p_hat from stage 1 and feed a (D, t_col) RHS block instead.
    s = jax.lax.dot_general(prow_ref[...], pcol_ref[...],
                            dimension_numbers=(((1,), (1,)), ((), ())),
                            preferred_element_type=jnp.float32)   # (t_row, t_col)

    def _update(sv):
        m_prev = m_sc[...]                                        # (t_row, 1)
        m_new = jnp.maximum(m_prev, jnp.max(sv, axis=-1, keepdims=True))
        p = jnp.exp(sv - m_new)                                   # masked -> exactly 0
        l_sc[...] = jnp.exp(m_prev - m_new) * l_sc[...] + jnp.sum(
            p, axis=-1, keepdims=True)
        m_sc[...] = m_new

    row0 = i * t_row
    col0 = j * t_col
    # Scalar per-tile conditions: masking VPU work only runs on the few tiles
    # that actually touch the diagonal or the zero-padded columns.
    has_diag = jnp.logical_and(col0 < row0 + t_row, row0 < col0 + t_col)
    if padded:
        pad0 = jnp.logical_and(col0 < b_pad, col0 + t_col > batch)
        pad1 = col0 + t_col > b_pad + batch
        need_mask = jnp.logical_or(has_diag, jnp.logical_or(pad0, pad1))
    else:
        need_mask = has_diag

    @pl.when(need_mask)
    def _():
        rr = jax.lax.broadcasted_iota(jnp.int32, s.shape, 0) + row0
        cc = jax.lax.broadcasted_iota(jnp.int32, s.shape, 1) + col0
        mask = rr == cc                      # rows never compete against themselves
        if padded:                           # exclude zero-padded columns
            pad_col = jnp.logical_or(
                jnp.logical_and(cc >= batch, cc < b_pad), cc >= b_pad + batch)
            mask = jnp.logical_or(mask, pad_col)
        _update(jnp.where(mask, -jnp.inf, s))

    @pl.when(jnp.logical_not(need_mask))
    def _():
        _update(s)

    @pl.when(j == pl.num_programs(1) - 1)
    def _():
        lse_ref[...] = m_sc[...] + jnp.log(l_sc[...])


def ntxent_loss(z_i, z_j, temperature, *, phat_dtype=jnp.bfloat16,
                block_rows=None, block_cols=None):
    """NT-Xent loss matching NTXent.forward semantics (returns scalar f32).

    p_hat (normalized + 1/sqrt(T)-scaled embeddings) is stored in `phat_dtype`
    (bfloat16 by default: half the stage-2 HBM traffic / VMEM, native-rate MXU;
    accumulation stays f32).  Pass jnp.float32 for full-precision logits.
    """
    assert z_i.shape == z_j.shape and z_i.ndim == 2
    batch, dim = z_i.shape
    assert batch >= 1
    n = 2 * batch
    scale = 1.0 / math.sqrt(float(temperature))
    phat_bytes = jnp.dtype(phat_dtype).itemsize

    limit, budget = _vmem_plan()
    n_pad, t_row, t_col = _stage2_plan(n, dim, phat_bytes, budget,
                                       block_rows, block_cols)
    b_pad = n_pad // 2
    padded = b_pad > batch

    if padded:  # pad each half with zero rows; they are masked out of the lse
        pad = ((0, b_pad - batch), (0, 0))
        z_i = jnp.pad(z_i, pad)
        z_j = jnp.pad(z_j, pad)

    # ---- stage 1: row normalization + positives (O(N*D)) -------------------
    tb = _stage1_tile(b_pad, dim, phat_bytes, budget)
    p_hat3, pos = pl.pallas_call(
        functools.partial(_prep_kernel, scale=scale),
        out_shape=(jax.ShapeDtypeStruct((2, b_pad, dim), phat_dtype),
                   jax.ShapeDtypeStruct((b_pad, 1), jnp.float32)),
        grid_spec=pl.GridSpec(
            grid=(b_pad // tb,),
            in_specs=[pl.BlockSpec((tb, dim), lambda i: (i, 0)),
                      pl.BlockSpec((tb, dim), lambda i: (i, 0))],
            out_specs=(pl.BlockSpec((2, tb, dim), lambda i: (0, i, 0)),
                       pl.BlockSpec((tb, 1), lambda i: (i, 0))),
        ),
        compiler_params=pltpu.CompilerParams(
            dimension_semantics=("parallel",),
            vmem_limit_bytes=limit),
    )(z_i, z_j)
    p_hat = p_hat3.reshape(n_pad, dim)   # contiguous reshape: free, no concat copy

    # ---- stage 2: tiled off-diagonal logsumexp over the (n, n) sim matrix --
    lse = pl.pallas_call(
        functools.partial(_lse_kernel, t_row=t_row, t_col=t_col,
                          batch=batch, b_pad=b_pad, padded=padded),
        out_shape=jax.ShapeDtypeStruct((n_pad, 1), jnp.float32),
        grid_spec=pltpu.PrefetchScalarGridSpec(
            num_scalar_prefetch=0,
            grid=(n_pad // t_row, n_pad // t_col),
            in_specs=[pl.BlockSpec((t_row, dim), lambda i, j: (i, 0)),
                      pl.BlockSpec((t_col, dim), lambda i, j: (j, 0))],
            out_specs=pl.BlockSpec((t_row, 1), lambda i, j: (i, 0)),
            scratch_shapes=[pltpu.VMEM((t_row, 1), jnp.float32),
                            pltpu.VMEM((t_row, 1), jnp.float32)],
        ),
        compiler_params=pltpu.CompilerParams(
            dimension_semantics=("parallel", "arbitrary"),
            vmem_limit_bytes=limit),
    )(p_hat, p_hat)

    # Tiny O(N) epilogue.
    lse = lse[:, 0]
    if padded:
        rows = jnp.arange(n_pad)
        valid = jnp.logical_or(
            rows < batch, jnp.logical_and(rows >= b_pad, rows < b_pad + batch))
        lse_sum = jnp.sum(jnp.where(valid, lse, 0.0))
        pos_sum = jnp.sum(pos[:batch, 0])
    else:
        lse_sum = jnp.sum(lse)
        pos_sum = jnp.sum(pos)
    return (lse_sum - 2.0 * pos_sum) / jnp.float32(n)


def _reference_ntxent(z_i, z_j, temperature):
    """Pure-JAX reference mirroring the PyTorch module exactly."""
    b = z_i.shape[0]
    p = jnp.concatenate([z_i, z_j], axis=0).astype(jnp.float32)
    norm = jnp.sqrt(jnp.sum(p * p, axis=-1, keepdims=True))
    sim = (p @ p.T) / jnp.maximum(norm * norm.T, _EPS) / temperature
    n = 2 * b
    idx = jnp.arange(n)
    pos_col = jnp.where(idx < b, idx + b, idx - b)
    positives = sim[idx, pos_col]
    sim_masked = jnp.where(idx[:, None] == idx[None, :], -jnp.inf, sim)
    lse = jax.scipy.special.logsumexp(sim_masked, axis=-1)
    return jnp.sum(lse - positives) / n


if __name__ == "__main__":
    key = jax.random.PRNGKey(0)
    k1, k2, k3, k4 = jax.random.split(key, 4)
    temperature = 0.5

    # Case 1: shapes implied by the module (single column-resident tile).
    batch, hidden = 4, 32
    z_i = jax.random.normal(k1, (batch, hidden), dtype=jnp.float32)
    z_j = jax.random.normal(k2, (batch, hidden), dtype=jnp.float32)
    loss = jax.block_until_ready(ntxent_loss(z_i, z_j, temperature))
    ref = jax.block_until_ready(_reference_ntxent(z_i, z_j, temperature))
    assert jnp.isfinite(loss), "kernel produced non-finite loss"
    # bf16 p_hat storage costs ~3 decimal digits in the logits -> looser tol.
    assert jnp.allclose(loss, ref, rtol=2e-2, atol=2e-2), (loss, ref)

    # Case 2: exercise the multi-tile streaming path + batch padding/masking
    # (tiny forced 16x16 tiles; production sizes auto-pick 512/256 etc.).
    batch2, hidden2 = 10, 32
    z_i2 = jax.random.normal(k3, (batch2, hidden2), dtype=jnp.float32)
    z_j2 = jax.random.normal(k4, (batch2, hidden2), dtype=jnp.float32)
    loss2 = jax.block_until_ready(
        ntxent_loss(z_i2, z_j2, temperature, block_rows=16, block_cols=16))
    ref2 = jax.block_until_ready(_reference_ntxent(z_i2, z_j2, temperature))
    assert jnp.isfinite(loss2), "kernel produced non-finite loss (tiled path)"
    assert jnp.allclose(loss2, ref2, rtol=2e-2, atol=2e-2), (loss2, ref2)

    print("KERNEL_OK")
</pallas_src>

<mosaic_0001>
module attributes {stable_mosaic.version = 11 : i64} {
  func.func @_prep_kernel(%arg0: i32, %arg1: memref<4x32xf32, #tpu.memory_space<vmem>>, %arg2: memref<4x32xf32, #tpu.memory_space<vmem>>, %arg3: memref<2x4x32xbf16, #tpu.memory_space<vmem>>, %arg4: memref<4x1xf32, #tpu.memory_space<vmem>>) attributes {dimension_semantics = [#tpu.dimension_semantics<parallel>], iteration_bounds = array<i64: 1>, scalar_prefetch = 0 : i64, scratch_operands = 0 : i64, tpu.core_type = #tpu.core_type<tc>, window_params = [{transform_indices = @transform_0, window_bounds = array<i64: 4, 32>}, {transform_indices = @transform_1, window_bounds = array<i64: 4, 32>}, {transform_indices = @transform_2, window_bounds = array<i64: 2, 4, 32>}, {transform_indices = @transform_3, window_bounds = array<i64: 4, 1>}]} {
    %c0 = arith.constant 0 : index
    %c0_0 = arith.constant 0 : index
    %0 = vector.load %arg1[%c0, %c0_0] : memref<4x32xf32, #tpu.memory_space<vmem>>, vector<4x32xf32>
    %c0_1 = arith.constant 0 : index
    %c0_2 = arith.constant 0 : index
    %1 = vector.load %arg2[%c0_1, %c0_2] : memref<4x32xf32, #tpu.memory_space<vmem>>, vector<4x32xf32>
    %2 = arith.mulf %0, %0 : vector<4x32xf32>
    %cst = arith.constant dense<0.000000e+00> : vector<4xf32>
    %3 = vector.multi_reduction <add>, %2, %cst [1] : vector<4x32xf32> to vector<4xf32>
    %4 = vector.shape_cast %3 : vector<4xf32> to vector<4x1xf32>
    %cst_3 = arith.constant 9.99999993E-9 : f32
    %5 = vector.broadcast %cst_3 : f32 to vector<4x1xf32>
    %6 = arith.maximumf %4, %5 : vector<4x1xf32>
    %7 = math.rsqrt %6 : vector<4x1xf32>
    %cst_4 = arith.constant 1.41421354 : f32
    %8 = vector.broadcast %cst_4 : f32 to vector<4x1xf32>
    %9 = arith.mulf %7, %8 : vector<4x1xf32>
    %10 = vector.broadcast %9 : vector<4x1xf32> to vector<4x32xf32>
    %11 = arith.mulf %0, %10 : vector<4x32xf32>
    %12 = arith.mulf %1, %1 : vector<4x32xf32>
    %cst_5 = arith.constant dense<0.000000e+00> : vector<4xf32>
    %13 = vector.multi_reduction <add>, %12, %cst_5 [1] : vector<4x32xf32> to vector<4xf32>
    %14 = vector.shape_cast %13 : vector<4xf32> to vector<4x1xf32>
    %cst_6 = arith.constant 9.99999993E-9 : f32
    %15 = vector.broadcast %cst_6 : f32 to vector<4x1xf32>
    %16 = arith.maximumf %14, %15 : vector<4x1xf32>
    %17 = math.rsqrt %16 : vector<4x1xf32>
    %cst_7 = arith.constant 1.41421354 : f32
    %18 = vector.broadcast %cst_7 : f32 to vector<4x1xf32>
    %19 = arith.mulf %17, %18 : vector<4x1xf32>
    %20 = vector.broadcast %19 : vector<4x1xf32> to vector<4x32xf32>
    %21 = arith.mulf %1, %20 : vector<4x32xf32>
    %22 = arith.truncf %11 : vector<4x32xf32> to vector<4x32xbf16>
    %c0_8 = arith.constant 0 : index
    %c0_9 = arith.constant 0 : index
    %c0_10 = arith.constant 0 : index
    %23 = vector.load %arg3[%c0_8, %c0_9, %c0_10] : memref<2x4x32xbf16, #tpu.memory_space<vmem>>, vector<1x4x32xbf16>
    %24 = vector.shape_cast %23 : vector<1x4x32xbf16> to vector<4x32xbf16>
    %25 = vector.shape_cast %22 : vector<4x32xbf16> to vector<1x4x32xbf16>
    tpu.vector_store %arg3[%c0_8, %c0_9, %c0_10], %25 {strides = array<i32>} : memref<2x4x32xbf16, #tpu.memory_space<vmem>>, vector<1x4x32xbf16>,
    %26 = arith.truncf %21 : vector<4x32xf32> to vector<4x32xbf16>
    %c1 = arith.constant 1 : index
    %c0_11 = arith.constant 0 : index
    %c0_12 = arith.constant 0 : index
    %27 = vector.load %arg3[%c1, %c0_11, %c0_12] : memref<2x4x32xbf16, #tpu.memory_space<vmem>>, vector<1x4x32xbf16>
    %28 = vector.shape_cast %27 : vector<1x4x32xbf16> to vector<4x32xbf16>
    %29 = vector.shape_cast %26 : vector<4x32xbf16> to vector<1x4x32xbf16>
    tpu.vector_store %arg3[%c1, %c0_11, %c0_12], %29 {strides = array<i32>} : memref<2x4x32xbf16, #tpu.memory_space<vmem>>, vector<1x4x32xbf16>,
    %30 = arith.mulf %11, %21 : vector<4x32xf32>
    %cst_13 = arith.constant dense<0.000000e+00> : vector<4xf32>
    %31 = vector.multi_reduction <add>, %30, %cst_13 [1] : vector<4x32xf32> to vector<4xf32>
    %32 = vector.shape_cast %31 : vector<4xf32> to vector<4x1xf32>
    %c0_14 = arith.constant 0 : index
    %c0_15 = arith.constant 0 : index
    %33 = vector.load %arg4[%c0_14, %c0_15] : memref<4x1xf32, #tpu.memory_space<vmem>>, vector<4x1xf32>
    tpu.vector_store %arg4[%c0_14, %c0_15], %32 {strides = array<i32>} : memref<4x1xf32, #tpu.memory_space<vmem>>, vector<4x1xf32>,
    return
  }
  func.func @transform_0(%arg0: i32) -> (i32, i32) {
    %c0_i32 = arith.constant 0 : i32
    %c0_i32_0 = arith.constant 0 : i32
    return %arg0, %c0_i32 : i32, i32
  }
  func.func @transform_1(%arg0: i32) -> (i32, i32) {
    %c0_i32 = arith.constant 0 : i32
    %c0_i32_0 = arith.constant 0 : i32
    return %arg0, %c0_i32 : i32, i32
  }
  func.func @transform_2(%arg0: i32) -> (i32, i32, i32) {
    %c0_i32 = arith.constant 0 : i32
    %c0_i32_0 = arith.constant 0 : i32
    %c0_i32_1 = arith.constant 0 : i32
    return %c0_i32, %arg0, %c0_i32_0 : i32, i32, i32
  }
  func.func @transform_3(%arg0: i32) -> (i32, i32) {
    %c0_i32 = arith.constant 0 : i32
    %c0_i32_0 = arith.constant 0 : i32
    return %arg0, %c0_i32 : i32, i32
  }
}

</mosaic_0001>

<bundles_post_ra>
// kernel: tpu_custom_call.1
= control target key start
LH: loop header
LB: loop body
LE: loop exit
PB: predicated region body
PF: predicated region fallthrough
CT: control target
= control target key end

     0   :  { %9 = vsyncpa [#allocation3], 0  ;;  %s239_s0 = inlined_call_operand.hbm [shape: f32[4,32], index: 0, kind: input, shape index: {}]   ;;  %s240_s1 = inlined_call_operand.hbm [shape: f32[4,32], index: 1, kind: input, shape index: {}]   ;;  %s241_s2 = inlined_call_operand.hbm [shape: bf16[2,4,32], index: 2, kind: output, shape index: {0}]   ;;  %s242_s3 = inlined_call_operand.vmem [shape: f32[4,1], index: 3, kind: output, shape index: {1}]  }
   0x1   :  { %10 = vsyncpa [#allocation6], 0 }
   0x2   :  { %11 = vsyncpa [#allocation4], 0  ;;  %s172_s12 = smov [#allocation2]   ;;  %s173_s14 = smov [#allocation5]  }
   0x3   :  { %s18_s13 = sshll.u32 %s172_s12, 4  ;;  %s28_s15 = sshll.u32 %s173_s14, 4  ;;  %s19_s13 = int_to_ptr.vmem [resolvable:$true] %s18_s13  ;;  %s29_s15 = int_to_ptr.vmem [resolvable:$true] %s28_s15 }
   0x4   :  { %s100_s18 = scalar_lea.hbm %s239_s0, 64 }
   0x5   :  { %p101_p0 = scmp.ne.s32.totalorder %s239_s0, %s100_s18  ;;  %p104_p1 = scmp.lt.u32.totalorder %s100_s18, %s239_s0 }
   0x7   :  { %p106_p2 = pnand %p104_p1, %p101_p0 }
   0x9   :  { %109 = shalt.err (!%p106_p2)
}
   0xa   :  { %s110_s23 = scalar_lea.vmem %s19_s13, 64  ;;  %p115_p4 = scmp.lt.s32.totalorder %s19_s13, %s19_s13 }
   0xb   :  { %p111_p3 = scmp.ne.s32.totalorder %s19_s13, %s110_s23  ;;  %p116_p5 = scmp.lt.s32.totalorder %s110_s23, %s110_s23 }
   0xd   :  { %p117_p6 = por %p116_p5, %p115_p4 }
   0xf   :  { %p118_p7 = pnand %p117_p6, %p111_p3 }
  0x11   :  { %121 = shalt.err (!%p118_p7)
}
  0x12   :  { %21 = dma.hbm_to_vmem [thread:$0]  %s239_s0, 64, %s19_s13, [#allocation3]  }
  0x13   :  { %s122_s28 = scalar_lea.hbm %s240_s1, 64 }
  0x14   :  { %p123_p8 = scmp.ne.s32.totalorder %s240_s1, %s122_s28  ;;  %p126_p9 = scmp.lt.u32.totalorder %s122_s28, %s240_s1 }
  0x16   :  { %p128_p10 = pnand %p126_p9, %p123_p8 }
  0x18   :  { %131 = shalt.err (!%p128_p10)
}
  0x19   :  { %s132_s6 = scalar_lea.vmem %s29_s15, 64  ;;  %p137_p12 = scmp.lt.s32.totalorder %s29_s15, %s29_s15 }
  0x1a   :  { %p133_p11 = scmp.ne.s32.totalorder %s29_s15, %s132_s6  ;;  %p138_p13 = scmp.lt.s32.totalorder %s132_s6, %s132_s6 }
  0x1c   :  { %p139_p0 = por %p138_p13, %p137_p12 }
  0x1e   :  { %p140_p1 = pnand %p139_p0, %p133_p11 }
  0x20   :  { %143 = shalt.err (!%p140_p1)
}
  0x21   :  { %31 = dma.hbm_to_vmem [thread:$0]  %s240_s1, 64, %s29_s15, [#allocation6]  }
  0x22   :  { %166 = dma.done.wait [#allocation3], 64  }
  0x23   :  { %167 = vsyncadd [#allocation3], 4294967232 }
  0x24   :  { %168 = dma.done.wait [#allocation6], 64  }
  0x25   :  { %169 = vsyncadd [#allocation6], 4294967232  ;;  %v38_v0 = vld [vmem:[#allocation2] sm:$0xf]  ;;  %vm41_vm0 = vcmask 257024   ;;  %vm58_vm1 = vcmask 254976  }
  0x26   :  { %v39_v1 = vld [vmem:[#allocation5] sm:$0xf]  ;;  %v40_v2 = vmul.f32 %v38_v0, %v38_v0  ;;  %s174_s1 = smov [#allocation7]  }
  0x27   :  { %v49_v3 = vmul.f32 %v39_v1, %v39_v1  ;;  %s74_s8 = sshll.u32 %s174_s1, 4  ;;  %s75_s8 = int_to_ptr.vmem [resolvable:$true] %s74_s8 }
  0x28   :  { %v42_v4 = vsel %vm41_vm0, %v40_v2, 0.0  ;;  %s144_s9 = scalar_lea.vmem %s75_s8, 64  ;;  %p149_p3 = scmp.lt.s32.totalorder %s75_s8, %s75_s8 }
  0x29   :  { %43 = vadd.xlane.f32.xlu0 %v42_v4  ;;  %v50_v5 = vsel %vm41_vm0, %v49_v3, 0.0  ;;  %p145_p2 = scmp.ne.s32.totalorder %s75_s8, %s144_s9  ;;  %p150_p4 = scmp.lt.s32.totalorder %s144_s9, %s144_s9 }
  0x2b   :  { %p151_p5 = por %p150_p4, %p149_p3 }
  0x2d   :  { %51 = vadd.xlane.f32.xlu0 %v50_v5  ;;  %p152_p6 = pnand %p151_p5, %p145_p2 }
  0xb6   :  { %v44_v6 = vpop.xlane.xlu0 %43 }
  0xb7   :  { %v45_v7 = vmax.f32 %v44_v6, 1e-08 }
  0xb9   :  { %96 = vrsqrt.f32 %v45_v7 }
  0xba   :  { %v52_v8 = vpop.xlane.xlu0 %51 }
  0xbb   :  { %v53_v9 = vmax.f32 %v52_v8, 1e-08 }
  0xbd   :  { %98 = vrsqrt.f32 %v53_v9 }
  0xc3   :  { %v97_v10 = vpop.eup %96 }
  0xc4   :  { %v47_v11 = vmul.f32 1.4142135, %v97_v10 }
  0xc6   :  { %v48_v12 = vmul.f32 %v47_v11, %v38_v0 }
  0xc7   :  { %v99_v13 = vpop.eup %98 }
  0xc8   :  { %v55_v14 = vmul.f32 1.4142135, %v99_v13  ;;  %v57_v15 = vpack.c.bf16 %v48_v12, %v48_v12 }
  0xca   :  { %v56_v16 = vmul.f32 %v55_v14, %v39_v1  ;;  %59 = vst.msk [vmem:[#allocation7] sm:$0x3] %vm58_vm1, %v57_v15 }
  0xcc   :  { %v63_v17 = vmul.f32 %v56_v16, %v48_v12  ;;  %v60_v18 = vpack.c.bf16 %v56_v16, %v56_v16 }
  0xce   :  { %v64_v19 = vsel %vm41_vm0, %v63_v17, 0.0  ;;  %62 = vst.msk [vmem:[#allocation7 + $0x2] sm:$0x3] %vm58_vm1, %v60_v18 }
  0xcf   :  { %65 = vadd.xlane.f32.xlu1 %v64_v19 }
  0xd0   :  { %155 = shalt.err (!%p152_p6)
}
  0xd1   :  { %s156_s12 = scalar_lea.hbm %s241_s2, 64 }
  0xd2   :  { %p157_p7 = scmp.ne.s32.totalorder %s241_s2, %s156_s12  ;;  %p160_p8 = scmp.lt.u32.totalorder %s156_s12, %s241_s2 }
  0xd4   :  { %p162_p9 = pnand %p160_p8, %p157_p7 }
  0xd6   :  { %165 = shalt.err (!%p162_p9)
}
  0xd7   :  { %s175_s17 = smov 32   ;;  %s176_s18 = smov 2   ;;  %vm67_vm2 = vcmask 3072  }
  0xd8   :  { %80 = dma.vmem_to_hbm [thread:$0]  %s75_s8, 64, %s241_s2, [#allocation4], %s175_s17, %s175_s17, %s176_s18  }
 0x15c   :  { %v66_v20 = vpop.xlane.xlu1 %65 }
 0x15d   :  { %68 = vst.msk [vmem:[%s242_s3] sm:$0xf] %vm67_vm2, %v66_v20 }
 0x15e   :  { %170 = dma.done.wait [#allocation4], 64  }
 0x15f   :  { %171 = vsyncadd [#allocation4], 4294967232 }
 0x160   :  { %88 = vsyncpa [#allocation3], 1 }
 0x161   :  { %89 = vsyncpa [#allocation6], 1 }
 0x162   :  { %90 = vsyncpa [#allocation4], 1 }

</bundles_post_ra>
